<compile_context>
chip_gen: v7x
topology: tpu7x:2x2x1
jax: 0.10.0
libtpu: 0.0.40
codegen_flags: <defaults>
</compile_context>

<pallas_src>
import functools

import jax
import jax.numpy as jnp
from jax.experimental import pallas as pl
from jax.experimental.pallas import tpu as pltpu


# --------------------------------------------------------------------------
# Kernel 1: fused 1x1-conv (VPU FMAs) + folded BatchNorm affine + PReLU,
#           emitting lane-dense per-tile min/max partials.
# Refs: x (C_in, rows, 128), w_eff (C_out, C_in) SMEM, shift (C_out,) SMEM,
#       alpha (1,) SMEM -> y (C_out, rows, 128), mn (8, 128), mx (8, 128)
# --------------------------------------------------------------------------
def _conv_bn_prelu_kernel(x_ref, w_ref, shift_ref, alpha_ref,
                          y_ref, mn_ref, mx_ref, *, hw, need_mask):
    c_in, rows, lanes = x_ref.shape
    c_out = y_ref.shape[0]
    alpha = alpha_ref[0]                      # PReLU scalar

    if need_mask:
        # Padded pixels exist (hw was rounded up to num_tiles*rows*128):
        # mask them out of the min/max only (their y values are sliced away).
        j = pl.program_id(1)
        row_idx = jax.lax.broadcasted_iota(jnp.int32, (rows, lanes), 0)
        lane_idx = jax.lax.broadcasted_iota(jnp.int32, (rows, lanes), 1)
        gidx = j * (rows * lanes) + row_idx * lanes + lane_idx
        mask = gidx < hw

    # Full-vreg (rows, 128) slabs per input channel; cast in-kernel.
    xs = [x_ref[c].astype(jnp.float32) for c in range(c_in)]

    run_min = None
    run_max = None
    for o in range(c_out):
        # 1x1 conv as scalar-broadcast FMAs (BN scale already folded into w).
        acc = w_ref[o, 0] * xs[0]
        for c in range(1, c_in):
            acc = acc + w_ref[o, c] * xs[c]
        acc = acc + shift_ref[o]                      # conv bias + BN shift
        acc = jnp.where(acc > 0, acc, alpha * acc)    # PReLU
        y_ref[o] = acc                                # dense (rows,128) store
        run_min = acc if run_min is None else jnp.minimum(run_min, acc)
        run_max = acc if run_max is None else jnp.maximum(run_max, acc)

    if need_mask:
        run_min = jnp.where(mask, run_min, jnp.inf)
        run_max = jnp.where(mask, run_max, -jnp.inf)

    # One cross-lane reduce per tile (not per output channel); lane-dense
    # (8,128) slab writes keep the store path unmasked.
    tmin = jnp.min(run_min)
    tmax = jnp.max(run_max)
    mn_ref[...] = jnp.full((8, lanes), tmin, jnp.float32)
    mx_ref[...] = jnp.full((8, lanes), tmax, jnp.float32)


# --------------------------------------------------------------------------
# Kernel 2: global min-max normalization, one FMA per element:
#           out = y * inv - off  with inv = 1/(max-min), off = min*inv.
# --------------------------------------------------------------------------
def _normalize_kernel(y_ref, norm_ref, o_ref):
    inv = norm_ref[0]
    off = norm_ref[1]
    o_ref[...] = y_ref[...] * inv - off


def _choose_tiling(hw, n, x_itemsize, c_in, c_out, max_tile_m):
    """Pick (rows_per_tile, num_tiles, lanes) for a (rows, 128) dense layout."""
    lanes = 128
    rows_total = -(-hw // lanes)
    # sublane granularity for the input dtype (f32 -> 8, bf16 -> 16, int8 -> 32)
    sub = 8 if x_itemsize >= 4 else (16 if x_itemsize == 2 else 32)
    # cap rows so the double-buffered in+out working set stays ~<= 12 MiB
    bytes_per_row = lanes * (c_in * x_itemsize + c_out * 4)
    max_rows = min(max(sub, max_tile_m // lanes),
                   max(sub, (12 * 1024 * 1024) // max(1, 2 * bytes_per_row)))
    max_rows = max(sub, (max_rows // sub) * sub)

    if rows_total <= max_rows:
        if n == 1 and rows_total >= 2 * sub:
            # Guarantee >= 2 grid steps on a parallel axis (v7x has 2 TCs).
            rows = ((-(-rows_total // 2) + sub - 1) // sub) * sub
        else:
            rows = rows_total        # single tile: block == full dim (legal)
    else:
        rows = max_rows
    num_tiles = -(-rows_total // rows)
    return rows, num_tiles, lanes


def out_conv_forward(x_nchw, params, *, max_tile_m=65536):
    """OutConv forward. x_nchw: (N, C_in, H, W) -> (N, C_out, H, W) float32."""
    w, b, gamma, beta, run_mean, run_var, prelu_a = (
        params["w"], params["b"], params["gamma"], params["beta"],
        params["running_mean"], params["running_var"], params["prelu_a"])
    eps = 1e-5

    n, c_in, h, wd = x_nchw.shape
    c_out = w.shape[0]
    hw = h * wd

    # ---- host-side folding (O(C) work): conv bias + eval-mode BN ----------
    #   y[o] = sum_c (w[o,c]*s[o]) * x[c] + (b[o]*s[o] + beta[o] - mean[o]*s[o])
    w2 = w.reshape(c_out, c_in).astype(jnp.float32)
    s = (gamma.astype(jnp.float32) / jnp.sqrt(run_var.astype(jnp.float32) + eps))
    w_eff = w2 * s[:, None]                                             # (C_out, C_in)
    shift = (b.astype(jnp.float32) * s + beta.astype(jnp.float32)
             - run_mean.astype(jnp.float32) * s)                        # (C_out,)
    alpha = jnp.asarray(prelu_a, jnp.float32).reshape(1)

    # ---- sublane/lane dense tiling ----------------------------------------
    rows, num_tiles, lanes = _choose_tiling(
        hw, n, jnp.dtype(x_nchw.dtype).itemsize, c_in, c_out, max_tile_m)
    hw_pad = num_tiles * rows * lanes
    need_mask = hw_pad != hw

    # NCHW -> (N, C_in, rows_total, 128): pure reshape (pad only if needed).
    x3 = x_nchw.reshape(n, c_in, hw)
    if need_mask:
        x3 = jnp.pad(x3, ((0, 0), (0, 0), (0, hw_pad - hw)))
    x4 = x3.reshape(n, c_in, num_tiles * rows, lanes)

    grid = (n, num_tiles)
    kernel1 = functools.partial(_conv_bn_prelu_kernel, hw=hw, need_mask=need_mask)

    cparams = pltpu.CompilerParams(
        dimension_semantics=("parallel", "parallel"),
        vmem_limit_bytes=32 * 1024 * 1024)

    y4, mn, mx = pl.pallas_call(
        kernel1,
        out_shape=(
            jax.ShapeDtypeStruct((n, c_out, num_tiles * rows, lanes), jnp.float32),
            jax.ShapeDtypeStruct((n, num_tiles, 8, lanes), jnp.float32),
            jax.ShapeDtypeStruct((n, num_tiles, 8, lanes), jnp.float32),
        ),
        grid_spec=pltpu.PrefetchScalarGridSpec(
            num_scalar_prefetch=0,
            grid=grid,
            in_specs=[
                pl.BlockSpec((None, c_in, rows, lanes),
                             lambda bi, ti: (bi, 0, ti, 0)),                 # x
                pl.BlockSpec(memory_space=pltpu.MemorySpace.SMEM),           # w_eff
                pl.BlockSpec(memory_space=pltpu.MemorySpace.SMEM),           # shift
                pl.BlockSpec(memory_space=pltpu.MemorySpace.SMEM),           # alpha
            ],
            out_specs=[
                pl.BlockSpec((None, c_out, rows, lanes),
                             lambda bi, ti: (bi, 0, ti, 0)),                 # y
                pl.BlockSpec((None, None, 8, lanes),
                             lambda bi, ti: (bi, ti, 0, 0)),                 # min parts
                pl.BlockSpec((None, None, 8, lanes),
                             lambda bi, ti: (bi, ti, 0, 0)),                 # max parts
            ],
        ),
        compiler_params=cparams,
    )(x4, w_eff, shift, alpha)

    # Tiny host-side reduction of per-tile partials -> global min/max scalars.
    gmin = jnp.min(mn)
    gmax = jnp.max(mx)
    denom = gmax - gmin
    denom = jnp.where(denom > 0, denom, jnp.float32(1.0))   # constant-input guard
    inv = (1.0 / denom).astype(jnp.float32)
    off = (gmin * inv).astype(jnp.float32)
    norm = jnp.stack([inv, off])                             # (2,) SMEM scalars

    out4 = pl.pallas_call(
        _normalize_kernel,
        out_shape=jax.ShapeDtypeStruct(y4.shape, jnp.float32),
        grid_spec=pltpu.PrefetchScalarGridSpec(
            num_scalar_prefetch=0,
            grid=grid,
            in_specs=[
                pl.BlockSpec((None, c_out, rows, lanes),
                             lambda bi, ti: (bi, 0, ti, 0)),
                pl.BlockSpec(memory_space=pltpu.MemorySpace.SMEM),
            ],
            out_specs=pl.BlockSpec((None, c_out, rows, lanes),
                                   lambda bi, ti: (bi, 0, ti, 0)),
        ),
        input_output_aliases={0: 0},   # normalize in place over y4
        compiler_params=cparams,
    )(y4, norm)

    # (N, C_out, rows_total, 128) -> NCHW (drop padding only if it exists).
    out3 = out4.reshape(n, c_out, hw_pad)
    if need_mask:
        out3 = out3[:, :, :hw]
    return out3.reshape(n, c_out, h, wd)


def _reference_forward(x_nchw, params):
    """Plain-JAX reference of the same forward (eval-mode BN, global min-max)."""
    w, b, gamma, beta, run_mean, run_var, prelu_a = (
        params["w"], params["b"], params["gamma"], params["beta"],
        params["running_mean"], params["running_var"], params["prelu_a"])
    eps = 1e-5
    c_out, c_in = w.shape[0], w.shape[1]
    w2 = w.reshape(c_out, c_in)
    x = x_nchw.astype(jnp.float32)
    y = jnp.einsum("nchw,oc->nohw", x, w2) + b[None, :, None, None]
    y = ((y - run_mean[None, :, None, None])
         / jnp.sqrt(run_var + eps)[None, :, None, None]
         * gamma[None, :, None, None] + beta[None, :, None, None])
    y = jnp.where(y > 0, y, prelu_a * y)
    y = (y - y.min()) / (y.max() - y.min())
    return y


def _make_params(key, c_in, c_out):
    k_w, k_b, k_g, k_be, k_m, k_v = jax.random.split(key, 6)
    return {
        # Conv2d(in, out, 1): weight (C_out, C_in, 1, 1), bias (C_out,)
        "w": jax.random.normal(k_w, (c_out, c_in, 1, 1), jnp.float32) * 0.5,
        "b": jax.random.normal(k_b, (c_out,), jnp.float32) * 0.1,
        # BatchNorm2d(out): affine + running stats (eval mode)
        "gamma": 1.0 + 0.1 * jax.random.normal(k_g, (c_out,), jnp.float32),
        "beta": 0.1 * jax.random.normal(k_be, (c_out,), jnp.float32),
        "running_mean": 0.1 * jax.random.normal(k_m, (c_out,), jnp.float32),
        "running_var": jnp.abs(1.0 + 0.1 * jax.random.normal(k_v, (c_out,), jnp.float32)),
        # PReLU single scalar parameter (PyTorch default init)
        "prelu_a": jnp.float32(0.25),
    }


if __name__ == "__main__":
    key = jax.random.PRNGKey(0)
    k_p1, k_x1, k_p2, k_x2 = jax.random.split(key, 4)

    # --- Test 1: canonical small shape (N=2, C_in=4, C_out=2, 16x16) -------
    N, C_IN, C_OUT, H, W = 2, 4, 2, 16, 16
    params1 = _make_params(k_p1, C_IN, C_OUT)
    x1 = jax.random.normal(k_x1, (N, C_IN, H, W), jnp.float32)

    out1 = jax.block_until_ready(out_conv_forward(x1, params1))
    ref1 = _reference_forward(x1, params1)
    assert out1.shape == (N, C_OUT, H, W)
    assert jnp.allclose(out1, ref1, atol=1e-5, rtol=1e-5), "mismatch vs reference (test 1)"

    # --- Test 2: N=1 (forces 2-tile split) + non-128-multiple spatial size,
    #             exercising the padded/masked min-max path -----------------
    N2, H2, W2 = 1, 45, 45
    params2 = _make_params(k_p2, C_IN, C_OUT)
    x2 = jax.random.normal(k_x2, (N2, C_IN, H2, W2), jnp.float32)

    out2 = jax.block_until_ready(out_conv_forward(x2, params2))
    ref2 = _reference_forward(x2, params2)
    assert out2.shape == (N2, C_OUT, H2, W2)
    assert jnp.allclose(out2, ref2, atol=1e-5, rtol=1e-5), "mismatch vs reference (test 2)"

    print("KERNEL_OK")
</pallas_src>

<mosaic_0001>
module attributes {stable_mosaic.version = 11 : i64} {
  func.func @_conv_bn_prelu_kernel(%arg0: i32, %arg1: i32, %arg2: memref<1x4x2x128xf32, #tpu.memory_space<vmem>>, %arg3: memref<2x4xf32, #tpu.memory_space<smem>>, %arg4: memref<2xf32, #tpu.memory_space<smem>>, %arg5: memref<1xf32, #tpu.memory_space<smem>>, %arg6: memref<1x2x2x128xf32, #tpu.memory_space<vmem>>, %arg7: memref<1x1x8x128xf32, #tpu.memory_space<vmem>>, %arg8: memref<1x1x8x128xf32, #tpu.memory_space<vmem>>) attributes {dimension_semantics = [#tpu.dimension_semantics<parallel>, #tpu.dimension_semantics<parallel>], iteration_bounds = array<i64: 2, 1>, scalar_prefetch = 0 : i64, scratch_operands = 0 : i64, tpu.core_type = #tpu.core_type<tc>, window_params = [{transform_indices = @transform_0, window_bounds = array<i64: 1, 4, 2, 128>}, {transform_indices = @transform_1, window_bounds = array<i64: 2, 4>}, {transform_indices = @transform_2, window_bounds = array<i64: 2>}, {transform_indices = @transform_3, window_bounds = array<i64: 1>}, {transform_indices = @transform_4, window_bounds = array<i64: 1, 2, 2, 128>}, {transform_indices = @transform_5, window_bounds = array<i64: 1, 1, 8, 128>}, {transform_indices = @transform_6, window_bounds = array<i64: 1, 1, 8, 128>}]} {
    %c0 = arith.constant 0 : index
    %0 = memref.load %arg5[%c0] : memref<1xf32, #tpu.memory_space<smem>>
    %c0_0 = arith.constant 0 : index
    %c0_1 = arith.constant 0 : index
    %c0_2 = arith.constant 0 : index
    %c0_3 = arith.constant 0 : index
    %1 = vector.load %arg2[%c0_0, %c0_1, %c0_2, %c0_3] : memref<1x4x2x128xf32, #tpu.memory_space<vmem>>, vector<1x1x2x128xf32>
    %2 = vector.shape_cast %1 : vector<1x1x2x128xf32> to vector<2x128xf32>
    %c0_4 = arith.constant 0 : index
    %c1 = arith.constant 1 : index
    %c0_5 = arith.constant 0 : index
    %c0_6 = arith.constant 0 : index
    %3 = vector.load %arg2[%c0_4, %c1, %c0_5, %c0_6] : memref<1x4x2x128xf32, #tpu.memory_space<vmem>>, vector<1x1x2x128xf32>
    %4 = vector.shape_cast %3 : vector<1x1x2x128xf32> to vector<2x128xf32>
    %c0_7 = arith.constant 0 : index
    %c2 = arith.constant 2 : index
    %c0_8 = arith.constant 0 : index
    %c0_9 = arith.constant 0 : index
    %5 = vector.load %arg2[%c0_7, %c2, %c0_8, %c0_9] : memref<1x4x2x128xf32, #tpu.memory_space<vmem>>, vector<1x1x2x128xf32>
    %6 = vector.shape_cast %5 : vector<1x1x2x128xf32> to vector<2x128xf32>
    %c0_10 = arith.constant 0 : index
    %c3 = arith.constant 3 : index
    %c0_11 = arith.constant 0 : index
    %c0_12 = arith.constant 0 : index
    %7 = vector.load %arg2[%c0_10, %c3, %c0_11, %c0_12] : memref<1x4x2x128xf32, #tpu.memory_space<vmem>>, vector<1x1x2x128xf32>
    %8 = vector.shape_cast %7 : vector<1x1x2x128xf32> to vector<2x128xf32>
    %c0_13 = arith.constant 0 : index
    %c0_14 = arith.constant 0 : index
    %9 = memref.load %arg3[%c0_13, %c0_14] : memref<2x4xf32, #tpu.memory_space<smem>>
    %10 = vector.broadcast %9 : f32 to vector<2x128xf32>
    %11 = arith.mulf %10, %2 : vector<2x128xf32>
    %c0_15 = arith.constant 0 : index
    %c1_16 = arith.constant 1 : index
    %12 = memref.load %arg3[%c0_15, %c1_16] : memref<2x4xf32, #tpu.memory_space<smem>>
    %13 = vector.broadcast %12 : f32 to vector<2x128xf32>
    %14 = arith.mulf %13, %4 : vector<2x128xf32>
    %15 = arith.addf %11, %14 : vector<2x128xf32>
    %c0_17 = arith.constant 0 : index
    %c2_18 = arith.constant 2 : index
    %16 = memref.load %arg3[%c0_17, %c2_18] : memref<2x4xf32, #tpu.memory_space<smem>>
    %17 = vector.broadcast %16 : f32 to vector<2x128xf32>
    %18 = arith.mulf %17, %6 : vector<2x128xf32>
    %19 = arith.addf %15, %18 : vector<2x128xf32>
    %c0_19 = arith.constant 0 : index
    %c3_20 = arith.constant 3 : index
    %20 = memref.load %arg3[%c0_19, %c3_20] : memref<2x4xf32, #tpu.memory_space<smem>>
    %21 = vector.broadcast %20 : f32 to vector<2x128xf32>
    %22 = arith.mulf %21, %8 : vector<2x128xf32>
    %23 = arith.addf %19, %22 : vector<2x128xf32>
    %c0_21 = arith.constant 0 : index
    %24 = memref.load %arg4[%c0_21] : memref<2xf32, #tpu.memory_space<smem>>
    %25 = vector.broadcast %24 : f32 to vector<2x128xf32>
    %26 = arith.addf %23, %25 : vector<2x128xf32>
    %cst = arith.constant 0.000000e+00 : f32
    %27 = vector.broadcast %cst : f32 to vector<2x128xf32>
    %28 = arith.cmpf ogt, %26, %27 : vector<2x128xf32>
    %29 = vector.broadcast %0 : f32 to vector<2x128xf32>
    %30 = arith.mulf %29, %26 : vector<2x128xf32>
    %31 = arith.select %28, %26, %30 : vector<2x128xi1>, vector<2x128xf32>
    %c0_22 = arith.constant 0 : index
    %c0_23 = arith.constant 0 : index
    %c0_24 = arith.constant 0 : index
    %c0_25 = arith.constant 0 : index
    %32 = vector.load %arg6[%c0_22, %c0_23, %c0_24, %c0_25] : memref<1x2x2x128xf32, #tpu.memory_space<vmem>>, vector<1x1x2x128xf32>
    %33 = vector.shape_cast %32 : vector<1x1x2x128xf32> to vector<2x128xf32>
    %34 = vector.shape_cast %31 : vector<2x128xf32> to vector<1x1x2x128xf32>
    tpu.vector_store %arg6[%c0_22, %c0_23, %c0_24, %c0_25], %34 {strides = array<i32>} : memref<1x2x2x128xf32, #tpu.memory_space<vmem>>, vector<1x1x2x128xf32>,
    %c1_26 = arith.constant 1 : index
    %c0_27 = arith.constant 0 : index
    %35 = memref.load %arg3[%c1_26, %c0_27] : memref<2x4xf32, #tpu.memory_space<smem>>
    %36 = vector.broadcast %35 : f32 to vector<2x128xf32>
    %37 = arith.mulf %36, %2 : vector<2x128xf32>
    %c1_28 = arith.constant 1 : index
    %c1_29 = arith.constant 1 : index
    %38 = memref.load %arg3[%c1_28, %c1_29] : memref<2x4xf32, #tpu.memory_space<smem>>
    %39 = vector.broadcast %38 : f32 to vector<2x128xf32>
    %40 = arith.mulf %39, %4 : vector<2x128xf32>
    %41 = arith.addf %37, %40 : vector<2x128xf32>
    %c1_30 = arith.constant 1 : index
    %c2_31 = arith.constant 2 : index
    %42 = memref.load %arg3[%c1_30, %c2_31] : memref<2x4xf32, #tpu.memory_space<smem>>
    %43 = vector.broadcast %42 : f32 to vector<2x128xf32>
    %44 = arith.mulf %43, %6 : vector<2x128xf32>
    %45 = arith.addf %41, %44 : vector<2x128xf32>
    %c1_32 = arith.constant 1 : index
    %c3_33 = arith.constant 3 : index
    %46 = memref.load %arg3[%c1_32, %c3_33] : memref<2x4xf32, #tpu.memory_space<smem>>
    %47 = vector.broadcast %46 : f32 to vector<2x128xf32>
    %48 = arith.mulf %47, %8 : vector<2x128xf32>
    %49 = arith.addf %45, %48 : vector<2x128xf32>
    %c1_34 = arith.constant 1 : index
    %50 = memref.load %arg4[%c1_34] : memref<2xf32, #tpu.memory_space<smem>>
    %51 = vector.broadcast %50 : f32 to vector<2x128xf32>
    %52 = arith.addf %49, %51 : vector<2x128xf32>
    %cst_35 = arith.constant 0.000000e+00 : f32
    %53 = vector.broadcast %cst_35 : f32 to vector<2x128xf32>
    %54 = arith.cmpf ogt, %52, %53 : vector<2x128xf32>
    %55 = vector.broadcast %0 : f32 to vector<2x128xf32>
    %56 = arith.mulf %55, %52 : vector<2x128xf32>
    %57 = arith.select %54, %52, %56 : vector<2x128xi1>, vector<2x128xf32>
    %c0_36 = arith.constant 0 : index
    %c1_37 = arith.constant 1 : index
    %c0_38 = arith.constant 0 : index
    %c0_39 = arith.constant 0 : index
    %58 = vector.load %arg6[%c0_36, %c1_37, %c0_38, %c0_39] : memref<1x2x2x128xf32, #tpu.memory_space<vmem>>, vector<1x1x2x128xf32>
    %59 = vector.shape_cast %58 : vector<1x1x2x128xf32> to vector<2x128xf32>
    %60 = vector.shape_cast %57 : vector<2x128xf32> to vector<1x1x2x128xf32>
    tpu.vector_store %arg6[%c0_36, %c1_37, %c0_38, %c0_39], %60 {strides = array<i32>} : memref<1x2x2x128xf32, #tpu.memory_space<vmem>>, vector<1x1x2x128xf32>,
    %61 = arith.minimumf %31, %57 : vector<2x128xf32>
    %62 = arith.maximumf %31, %57 : vector<2x128xf32>
    %63 = vector.shape_cast %61 : vector<2x128xf32> to vector<1x2x128xf32>
    %cst_40 = arith.constant dense<0x7F800000> : vector<1xf32>
    %64 = vector.multi_reduction <minimumf>, %63, %cst_40 [1, 2] : vector<1x2x128xf32> to vector<1xf32>
    %65 = vector.shape_cast %64 : vector<1xf32> to vector<1x1x1xf32>
    %66 = vector.extract %65[0, 0, 0] : f32 from vector<1x1x1xf32>
    %67 = vector.shape_cast %62 : vector<2x128xf32> to vector<1x2x128xf32>
    %cst_41 = arith.constant dense<0xFF800000> : vector<1xf32>
    %68 = vector.multi_reduction <maximumf>, %67, %cst_41 [1, 2] : vector<1x2x128xf32> to vector<1xf32>
    %69 = vector.shape_cast %68 : vector<1xf32> to vector<1x1x1xf32>
    %70 = vector.extract %69[0, 0, 0] : f32 from vector<1x1x1xf32>
    %71 = vector.broadcast %66 : f32 to vector<8x128xf32>
    %c0_42 = arith.constant 0 : index
    %c0_43 = arith.constant 0 : index
    %c0_44 = arith.constant 0 : index
    %c0_45 = arith.constant 0 : index
    %72 = vector.load %arg7[%c0_42, %c0_43, %c0_44, %c0_45] : memref<1x1x8x128xf32, #tpu.memory_space<vmem>>, vector<1x1x8x128xf32>
    %73 = vector.shape_cast %72 : vector<1x1x8x128xf32> to vector<8x128xf32>
    %74 = vector.shape_cast %71 : vector<8x128xf32> to vector<1x1x8x128xf32>
    tpu.vector_store %arg7[%c0_42, %c0_43, %c0_44, %c0_45], %74 {strides = array<i32>} : memref<1x1x8x128xf32, #tpu.memory_space<vmem>>, vector<1x1x8x128xf32>,
    %75 = vector.broadcast %70 : f32 to vector<8x128xf32>
    %c0_46 = arith.constant 0 : index
    %c0_47 = arith.constant 0 : index
    %c0_48 = arith.constant 0 : index
    %c0_49 = arith.constant 0 : index
    %76 = vector.load %arg8[%c0_46, %c0_47, %c0_48, %c0_49] : memref<1x1x8x128xf32, #tpu.memory_space<vmem>>, vector<1x1x8x128xf32>
    %77 = vector.shape_cast %76 : vector<1x1x8x128xf32> to vector<8x128xf32>
    %78 = vector.shape_cast %75 : vector<8x128xf32> to vector<1x1x8x128xf32>
    tpu.vector_store %arg8[%c0_46, %c0_47, %c0_48, %c0_49], %78 {strides = array<i32>} : memref<1x1x8x128xf32, #tpu.memory_space<vmem>>, vector<1x1x8x128xf32>,
    return
  }
  func.func @transform_0(%arg0: i32, %arg1: i32) -> (i32, i32, i32, i32) {
    %c0_i32 = arith.constant 0 : i32
    %c0_i32_0 = arith.constant 0 : i32
    %c0_i32_1 = arith.constant 0 : i32
    return %arg0, %c0_i32, %arg1, %c0_i32_0 : i32, i32, i32, i32
  }
  func.func @transform_1(%arg0: i32, %arg1: i32) -> (i32, i32) {
    %c0_i32 = arith.constant 0 : i32
    %c0_i32_0 = arith.constant 0 : i32
    %c0_i32_1 = arith.constant 0 : i32
    return %c0_i32, %c0_i32_0 : i32, i32
  }
  func.func @transform_2(%arg0: i32, %arg1: i32) -> i32 {
    %c0_i32 = arith.constant 0 : i32
    %c0_i32_0 = arith.constant 0 : i32
    return %c0_i32 : i32
  }
  func.func @transform_3(%arg0: i32, %arg1: i32) -> i32 {
    %c0_i32 = arith.constant 0 : i32
    %c0_i32_0 = arith.constant 0 : i32
    return %c0_i32 : i32
  }
  func.func @transform_4(%arg0: i32, %arg1: i32) -> (i32, i32, i32, i32) {
    %c0_i32 = arith.constant 0 : i32
    %c0_i32_0 = arith.constant 0 : i32
    %c0_i32_1 = arith.constant 0 : i32
    return %arg0, %c0_i32, %arg1, %c0_i32_0 : i32, i32, i32, i32
  }
  func.func @transform_5(%arg0: i32, %arg1: i32) -> (i32, i32, i32, i32) {
    %c0_i32 = arith.constant 0 : i32
    %c0_i32_0 = arith.constant 0 : i32
    %c0_i32_1 = arith.constant 0 : i32
    return %arg0, %arg1, %c0_i32, %c0_i32_0 : i32, i32, i32, i32
  }
  func.func @transform_6(%arg0: i32, %arg1: i32) -> (i32, i32, i32, i32) {
    %c0_i32 = arith.constant 0 : i32
    %c0_i32_0 = arith.constant 0 : i32
    %c0_i32_1 = arith.constant 0 : i32
    return %arg0, %arg1, %c0_i32, %c0_i32_0 : i32, i32, i32, i32
  }
}

</mosaic_0001>

<bundles_post_ra>
// kernel: tpu_custom_call.1
= control target key start
LH: loop header
LB: loop body
LE: loop exit
PB: predicated region body
PF: predicated region fallthrough
CT: control target
= control target key end

     0   :  { %s1339_s0 = inlined_call_operand.hbm [shape: f32[2,4,2,128], index: 0, kind: input, shape index: {}]   ;;  %s1340_s1 = inlined_call_operand.vmem [shape: f32[2,4], index: 1, kind: input, shape index: {}]   ;;  %s1341_s2 = inlined_call_operand.vmem [shape: f32[2], index: 2, kind: input, shape index: {}]   ;;  %s1342_s3 = inlined_call_operand.<no memory space> [shape: f32[1], index: 3, kind: input, shape index: {}]   ;;  %s1343_s4 = inlined_call_operand.hbm [shape: f32[2,2,2,128], index: 4, kind: output, shape index: {0}]   ;;  %s1344_s5 = inlined_call_operand.hbm [shape: f32[2,1,8,128], index: 5, kind: output, shape index: {1}]   ;;  %s1345_s6 = inlined_call_operand.hbm [shape: f32[2,1,8,128], index: 6, kind: output, shape index: {2}]  }
   0x1   :  { %1352 = sst [smem:[#allocation19_spill]] %s1340_s1 }
   0x2   :  { %12 = sst [smem:[#allocation2]] %s1342_s3 }
   0x3   :  { %13 = vsyncpa [#allocation4], 0 }
   0x4   :  { %15 = vsyncpa [#allocation4 + $0x1], 0 }
   0x5   :  { %16 = vsyncpa [#allocation6], 0 }
   0x6   :  { %17 = vsyncpa [#allocation9], 0 }
   0x7   :  { %18 = vsyncpa [#allocation5], 0 }
   0x8   :  { %20 = vsyncpa [#allocation5 + $0x1], 0 }
   0x9   :  { %21 = vsyncpa [#allocation12], 0 }
   0xa   :  { %23 = vsyncpa [#allocation12 + $0x1], 0  ;;  %s1041_s23 = smov 0   ;;  %s1043_s24 = smov 0  }
   0xb   :  { %s1045_s25 = smov 0   ;;  %s1047_s26 = smov 0  }
   0xc   :  { %s1049_s27 = smov 0   ;;  %s1051_s28 = smov 0  }
   0xd LB: > { %s1072_s3 = sadd.s32 4294967295, %s991_s28   ;;  %s1351_s29 = sadd.s32 4294967294, %s991_s28   ;;  %s991_s28 = sphi %s1051_s28, %s29_s28   ;;  %s987_s27 = sphi %s1049_s27, %s1376_s27   ;;  %s983_s26 = sphi %s1047_s26, %s1375_s26   ;;  %s979_s25 = sphi %s1045_s25, %s1374_s25   ;;  %s975_s24 = sphi %s1043_s24, %s1373_s24   ;;  %s971_s23 = sphi %s1041_s23, %s1372_s23  }
   0xe   : > { %s50_s30 = sadd.s32 1, %s979_s25  ;;  %p57_p0 = scmp.ne.s32.totalorder %s979_s25, %s975_s24 }
   0xf   : > { %p58_p1 = scmp.eq.s32.totalorder %s991_s28, 0  ;;  %p63_p2 = scmp.ne.s32.totalorder %s975_s24, %s971_s23 }
  0x10   : > { %p1348_p3 = scmp.eq.s32.totalorder %s1072_s3, 0  ;;  %p152_p4 = scmp.eq.s32.totalorder %s1072_s3, 1 }
  0x11   : > { %p1083_p5 = por %p58_p1, %p57_p0  ;;  %p158_p6 = scmp.eq.s32.totalorder %s1351_s29, 1 }
  0x12   : > { %p1091_p7 = por %p1348_p3, %p63_p2  ;;  %p1095_p8 = por %p152_p4, %p57_p0 }
  0x13   : > { %p1099_p9 = por %p158_p6, %p63_p2  ;;  %p643_p10 = scmp.ge.s32.totalorder %s991_s28, 1 }
  0x14   : > { %s1354_s8 = scalar_select %p1091_p7, 1, 0 }
  0x15   : > { %s1355_s9 = scalar_select %p1095_p8, 1, 0 }
  0x16   : > { %s1356_s10 = scalar_select %p1099_p9, 1, 0 }
  0x17   : > { %p221_p11 = scmp.lt.s32.totalorder %s991_s28, 3  ;;  %s1357_s1 = sld [smem:[#allocation19_spill]] }
  0x18   : > { %p723_p0 = scmp.lt.s32.totalorder %s991_s28, 2  ;;  %s245_s17 = sshll.u32 %s1341_s2, 4  ;;  %s246_s17 = int_to_ptr.vmem [resolvable:$true] %s245_s17 }
  0x19   : > { %p1108_p12 = pnand %p643_p10, %p221_p11 }
  0x1a   : > { %p1121_p2 = pnand %p723_p0, %p1083_p5 }
  0x1b   : > { %s1358_s14 = scalar_select %p1108_p12, 1, 0 }
  0x1c   : > { %p700_p1 = pneg %p1108_p12 }
  0x1d   : > { %s234_s13 = sshll.u32 %s1357_s1, 4  ;;  %s235_s13 = int_to_ptr.vmem [resolvable:$true] %s234_s13 }
  0x1e   : > { %s1359_s18 = scalar_select %p1121_p2, 1, 0 }
  0x1f   : > { %p1127_p4 = pnand %p700_p1, %p1348_p3  ;;  %s781_s20 = scalar_lea.vmem %s235_s13, 32 }
  0x20   : > { %p782_p6 = scmp.ne.s32.totalorder %s235_s13, %s781_s20  ;;  %p789_p9 = scmp.lt.s32.totalorder %s235_s13, %s235_s13 }
  0x21   : > { %p783_p10 = pneg %p1127_p4  ;;  %p790_p8 = scmp.lt.s32.totalorder %s781_s20, %s781_s20 }
  0x23   : > { %p784_p11 = pnand %p783_p10, %p782_p6  ;;  %p791_p7 = por %p790_p8, %p789_p9 }
  0x25   : > { %p785_p13 = pneg %p784_p11 }
  0x27   : > { %p792_p5 = pnand %p791_p7, %p785_p13 }
  0x29   : > { %795 = shalt.err (!%p792_p5)
}
  0x2a   : > { %s993_s21 = smov [#allocation7]   ;;  %s796_s22 = scalar_lea.vmem %s246_s17, 16 }
  0x2b   : > { %703 = dma.vmem_to_smem (!%p1127_p4), %s235_s13, 32, %s993_s21, [#allocation6]  }
  0x2c   : > { %p797_p0 = scmp.ne.s32.totalorder %s246_s17, %s796_s22  ;;  %p804_p12 = scmp.lt.s32.totalorder %s246_s17, %s246_s17 }
  0x2d   : > { %p805_p2 = scmp.lt.s32.totalorder %s796_s22, %s796_s22 }
  0x2e   : > { %p799_p1 = pnand %p797_p0, %p783_p10 }
  0x2f   : > { %p806_p6 = por %p805_p2, %p804_p12 }
  0x30   : > { %p800_p3 = pneg %p799_p1 }
  0x32   : > { %p807_p11 = pnand %p806_p6, %p800_p3 }
  0x34   : > { %810 = shalt.err (!%p807_p11)
}
  0x35   : > { %s994_s7 = smov [#allocation8]   ;;  %s41_s11 = sadd.s32 1, %s987_s27 }
  0x36   : > { %706 = dma.vmem_to_smem (!%p1127_p4), %s246_s17, 16, %s994_s7, [#allocation9]  }
  0x37   : > { %s259_s12 = sand.u32 1, %s979_s25   ;;  %p43_p7 = scmp.ge.s32.totalorder %s41_s11, 2 }
  0x38   : > { %s647_s13 = sshll.u32 %s259_s12, 3  ;;  %s678_s15 = sshll.u32 %s987_s27, 7 }
  0x39   : > { %s1378_s11 = smov (%p43_p7, %s41_s11), 0  ;;  %s1145_s19 = scalar_lea.hbm %s1339_s0, %s678_s15 }
  0x3a   : > { %s45_s21 = ssub.s32 %s987_s27, %s1378_s11  ;;  %s263_s17 = scalar_lea.vmem [#allocation3], %s647_s13 }
  0x3b   : > { %s271_s22 = sshll.u32 %s263_s17, 4  ;;  %p48_p3 = scmp.eq.s32.totalorder %s45_s21, 0  ;;  %s1149_s22 = int_to_ptr.vmem [resolvable:$true] %s271_s22 }
  0x3c   : > { %s1156_s29 = scalar_lea.sflag [#allocation4], %s259_s12  ;;  %s811_s1 = scalar_lea.hbm %s1145_s19, 128 }
  0x3d   : > { %s1154_s7 = scalar_select %p48_p3, %s979_s25, %s50_s30  }
  0x3e   : > { %p812_p8 = scmp.ne.s32.totalorder %s1145_s19, %s811_s1  ;;  %p1361_p9 = scmp.ne.s32.totalorder %s1359_s18, 0 }
  0x3f   : > { %s816_s13 = scalar_lea.hbm %s1339_s0, 256  ;;  %p817_p4 = scmp.lt.u32.totalorder %s1145_s19, %s1339_s0 }
  0x40   : > { %p813_p12 = pneg %p1361_p9  ;;  %p818_p10 = scmp.lt.u32.totalorder %s816_s13, %s811_s1 }
  0x41   : > { %p820_p0 = scmp.lt.u32.totalorder %s811_s1, %s1145_s19 }
  0x42   : > { %p814_p13 = pnand %p813_p12, %p812_p8  ;;  %p819_p5 = por %p818_p10, %p817_p4 }
  0x44   : > { %p815_p2 = pneg %p814_p13  ;;  %p821_p1 = por %p820_p0, %p819_p5 }
  0x46   : > { %p822_p6 = pnand %p821_p1, %p815_p2 }
  0x48   : > { %825 = shalt.err (!%p822_p6)
}
  0x49   : > { %s826_s30 = scalar_lea.vmem %s1149_s22, 128  ;;  %s995_s12 = smov [#allocation3]  }
  0x4a   : > { %p827_p11 = scmp.ne.s32.totalorder %s1149_s22, %s826_s30  ;;  %s831_s17 = sshll.u32 %s995_s12, 4  ;;  %s832_s17 = int_to_ptr.vmem [resolvable:$false] %s831_s17 }
  0x4b   : > { %s833_s15 = scalar_lea.vmem %s832_s17, 256  ;;  %p834_p8 = scmp.lt.s32.totalorder %s1149_s22, %s832_s17 }
  0x4c   : > { %p829_p7 = pnand %p827_p11, %p813_p12  ;;  %p835_p13 = scmp.lt.s32.totalorder %s833_s15, %s826_s30 }
  0x4e   : > { %p830_p3 = pneg %p829_p7  ;;  %p836_p4 = por %p835_p13, %p834_p8 }
  0x50   : > { %p837_p10 = pnand %p836_p4, %p830_p3 }
  0x52   : > { %840 = shalt.err (!%p837_p10)
}
  0x53   : > { %s996_s1 = smov 32   ;;  %s997_s16 = smov 2  }
  0x54   : > { %710 = dma.hbm_to_vmem [thread:$0]  (!%p1361_p9), %s1145_s19, 128, %s1149_s22, %s1156_s29, %s996_s1, %s996_s1, %s997_s16  }
  0x55   : > { %p1362_p12 = scmp.ne.s32.totalorder %s1358_s14, 0 }
  0x56   : > { %s1187_s13 = sand.u32 (!%p1362_p12), 1, %s975_s24   ;;  %p1363_p2 = scmp.ne.s32.totalorder (!%p1362_p12), %s1354_s8, 0 }
  0x57   : > { %283 = sbr.rel (%p1362_p12) target bundleno = 372 (0x174), region = 36  ;;  %s1190_s20 = sshll.u32 (!%p1362_p12), %s1187_s13, 3 }
  0x58   : > { %s286_s21 = scalar_lea.sflag (!%p1362_p12), [#allocation4], %s1187_s13  ;;  %s289_s30 = scalar_lea.vmem (!%p1362_p12), [#allocation3], %s1190_s20 }
  0x5e   : > { %950 = dma.done.wait (%p1363_p2), %s286_s21, 128  }
  0x5f   : > { %952 = vsyncadd (%p1363_p2), %s286_s21, 4294967168  ;;  %p1364_p9 = scmp.eq.s32.totalorder %s1072_s3, 0 }
  0x61   : > { %954 = dma.done.wait (%p1364_p9), [#allocation6], 32   ;;  %p1365_p5 = pmov %p1364_p9 }
  0x63   : > { %956 = vsyncadd (%p1365_p5), [#allocation6], 4294967264  ;;  %p1366_p0 = pmov %p1365_p5 }
  0x65   : > { %958 = dma.done.wait (%p1366_p0), [#allocation9], 16   ;;  %p1367_p1 = pmov %p1366_p0 }
  0x67   : > { %960 = vsyncadd (%p1367_p1), [#allocation9], 4294967280 }
  0x68   : > { %302 = sfence }
  0x69   : > { %s345_s29 = sld [smem:[#allocation7]]  ;;  %s660_s14 = sld [smem:[#allocation7 + $0x1]]  ;;  %v338_v0 = vld [vmem:[%s289_s30] sm:$0x3]  ;;  %v657_v1 = vld [vmem:[%s289_s30 + $0x2] sm:$0x3] }
  0x6a   : > { %s661_s18 = sld [smem:[#allocation7 + $0x2]]  ;;  %s662_s19 = sld [smem:[#allocation7 + $0x3]]  ;;  %v658_v2 = vld [vmem:[%s289_s30 + $0x4] sm:$0x3]  ;;  %v659_v3 = vld [vmem:[%s289_s30 + $0x6] sm:$0x3] }
  0x6b   : > { %s663_s22 = sld [smem:[#allocation7 + $0x80]]  ;;  %s664_s8 = sld [smem:[#allocation7 + $0x81]]  ;;  %vm393_vm2 = vcmask 1041408  }
  0x6c   : > { %s665_s12 = sld [smem:[#allocation7 + $0x82]]  ;;  %s666_s17 = sld [smem:[#allocation7 + $0x83]] }
  0x6d   : > { %s360_s15 = sld [smem:[#allocation8]]  ;;  %s1206_s1 = sld [smem:[#allocation2]] }
  0x6e   : > { %s667_s16 = sld [smem:[#allocation8 + $0x1]]  ;;  %s654_s21 = sshll.u32 %s1187_s13, 2 }
  0x6f   : > { %v346_v4 = vstv %s345_s29  ;;  %v349_v6 = vstv %s660_s14  ;;  %s322_s30 = scalar_lea.vmem [#allocation10], %s654_s21  ;;  %s679_s14 = sshll.u32 %s983_s26, 6 }
  0x70   : > { %v347_v5 = vmul.f32 %v346_v4, %v338_v0  ;;  %v353_v7 = vstv %s661_s18  ;;  %v350_v8 = vmul.f32 %v657_v1, %v349_v6  ;;  %v357_v10 = vstv %s662_s19  ;;  %s443_s29 = sshll.u32 %s322_s30, 4  ;;  %p1368_p11 = scmp.ne.s32.totalorder %s1355_s9, 0  ;;  %s1210_s29 = int_to_ptr.vmem [resolvable:$true] %s443_s29 }
  0x71   : > { %v354_v9 = vmul.f32 %v658_v2, %v353_v7  ;;  %v358_v11 = vmul.f32 %v659_v3, %v357_v10  ;;  %v369_v12 = vstv %s663_s22  ;;  %v372_v13 = vstv %s664_s8  ;;  %s1216_s22 = scalar_lea.hbm %s1343_s4, %s679_s14  ;;  %s419_s8 = scalar_lea.sflag [#allocation5], %s1187_s13 }
  0x72   : > { %v351_v14 = vadd.f32 %v350_v8, %v347_v5  ;;  %v370_v15 = vmul.f32 %v369_v12, %v338_v0  ;;  %v373_v16 = vmul.f32 %v657_v1, %v372_v13  ;;  %v376_v17 = vstv %s665_s12  ;;  %s841_s12 = scalar_lea.vmem %s1210_s29, 64 }
  0x73   : > { %v377_v18 = vmul.f32 %v658_v2, %v376_v17  ;;  %v380_v19 = vstv %s666_s17  ;;  %v361_v23 = vstv %s360_s15  ;;  %v364_v26 = vstv %s1206_s1  ;;  %p842_p6 = scmp.ne.s32.totalorder %s1210_s29, %s841_s12  ;;  %s998_s17 = smov [#allocation10]  }
  0x74   : > { %v355_v20 = vadd.f32 %v354_v9, %v351_v14  ;;  %v374_v21 = vadd.f32 %v373_v16, %v370_v15  ;;  %v381_v22 = vmul.f32 %v659_v3, %v380_v19  ;;  %v384_v27 = vstv %s667_s16  ;;  %s845_s15 = sshll.u32 %s998_s17, 4  ;;  %s846_s15 = int_to_ptr.vmem [resolvable:$false] %s845_s15 }
  0x75   : > { %p843_p7 = pnand %p842_p6, %p1368_p11  ;;  %s847_s1 = scalar_lea.vmem %s846_s15, 128 }
  0x76   : > { %v359_v24 = vadd.f32 %v358_v11, %v355_v20  ;;  %v378_v25 = vadd.f32 %v377_v18, %v374_v21  ;;  %p848_p8 = scmp.lt.s32.totalorder %s1210_s29, %s846_s15  ;;  %p849_p13 = scmp.lt.s32.totalorder %s847_s1, %s841_s12 }
  0x77   : > { %p844_p3 = pneg %p843_p7 }
  0x78   : > { %v362_v28 = vadd.f32 %v361_v23, %v359_v24  ;;  %v382_v29 = vadd.f32 %v381_v22, %v378_v25  ;;  %p850_p4 = por %p849_p13, %p848_p8 }
  0x7a   : > { %vm363_vm0 = vcmp.gt.f32.partialorder %v362_v28, 0.0  ;;  %v365_v30 = vmul.f32 %v364_v26, %v362_v28  ;;  %v385_v31 = vadd.f32 %v384_v27, %v382_v29  ;;  %p851_p10 = pnand %p850_p4, %p844_p3 }
  0x7c   : > { %v366_v32 = vsel %vm363_vm0, %v362_v28, %v365_v30  ;;  %vm386_vm1 = vcmp.gt.f32.partialorder %v385_v31, 0.0  ;;  %v387_v33 = vmul.f32 %v385_v31, %v364_v26 }
  0x7d   : > { %367 = vst [vmem:[%s322_s30] sm:$0x3] %v366_v32 }
  0x7e   : > { %v388_v34 = vsel %vm386_vm1, %v385_v31, %v387_v33 }
  0x7f   : > { %v391_v35 = vmin.f32 %v366_v32, %v388_v34  ;;  %668 = vst [vmem:[%s322_s30 + $0x2] sm:$0x3] %v388_v34  ;;  %v392_v36 = vmax.f32 %v366_v32, %v388_v34 }
  0x81   : > { %v394_v37 = vsel %vm393_vm2, %v391_v35, inf  ;;  %v404_v38 = vsel %vm393_vm2, %v392_v36, -inf }
  0x82   : > { %395 = vmin.xlane.f32.xlu0 %v394_v37 }
  0x86   : > { %405 = vmax.xlane.f32.xlu0 %v404_v38 }
  0x87   : > { %854 = shalt.err (!%p851_p10)
}
  0x88   : > { %s855_s16 = scalar_lea.hbm %s1216_s22, 64  ;;  %s859_s14 = scalar_lea.hbm %s1343_s4, 128 }
  0x89   : > { %p856_p12 = scmp.ne.s32.totalorder %s1216_s22, %s855_s16  ;;  %p860_p5 = scmp.lt.u32.totalorder %s1216_s22, %s1343_s4 }
  0x8a   : > { %p861_p0 = scmp.lt.u32.totalorder %s859_s14, %s855_s16  ;;  %p863_p6 = scmp.lt.u32.totalorder %s855_s16, %s1216_s22 }
  0x8b   : > { %p857_p2 = pnand %p856_p12, %p1368_p11 }
  0x8c   : > { %p862_p1 = por %p861_p0, %p860_p5 }
  0x8d   : > { %p858_p9 = pneg %p857_p2 }
  0x8e   : > { %p864_p7 = por %p863_p6, %p862_p1 }
  0x90   : > { %p865_p3 = pnand %p864_p7, %p858_p9 }
  0x92   : > { %868 = shalt.err (!%p865_p3)
}
  0x93   : > { %s999_s12 = smov 32   ;;  %s1000_s17 = smov 2  }
  0x94   : > { %694 = dma.vmem_to_hbm [thread:$0]  (%p1368_p11), %s1210_s29, 64, %s1216_s22, %s419_s8, %s999_s12, %s999_s12, %s1000_s17  }
  0x95   : > { %s423_s13 = sand.u32 1, %s1072_s3   ;;  %s674_s29 = sshll.u32 %s983_s26, 7 }
  0x96   : > { %s329_s22 = scalar_lea.vmem [#allocation11], %s1190_s20  ;;  %s336_s15 = scalar_lea.vmem [#allocation13], %s1190_s20 }
  0x97   : > { %s460_s8 = sshll.u32 %s329_s22, 4  ;;  %s474_s1 = sshll.u32 %s336_s15, 4  ;;  %s1255_s8 = int_to_ptr.vmem [resolvable:$true] %s460_s8  ;;  %s1257_s1 = int_to_ptr.vmem [resolvable:$true] %s474_s1 }
  0x98   : > { %s1253_s30 = scalar_lea.hbm %s1344_s5, %s674_s29  ;;  %s1259_s3 = scalar_lea.sflag [#allocation12], %s423_s13 }
  0x99   : > { %s869_s18 = scalar_lea.vmem %s1255_s8, 128  ;;  %s1001_s19 = smov [#allocation11]  }
  0x9a   : > { %p870_p8 = scmp.ne.s32.totalorder %s1255_s8, %s869_s18  ;;  %s873_s12 = sshll.u32 %s1001_s19, 4  ;;  %s874_s12 = int_to_ptr.vmem [resolvable:$false] %s873_s12 }
  0x9b   : > { %s875_s17 = scalar_lea.vmem %s874_s12, 256  ;;  %p876_p10 = scmp.lt.s32.totalorder %s1255_s8, %s874_s12 }
  0x9c   : > { %p871_p13 = pnand %p870_p8, %p1368_p11  ;;  %p877_p12 = scmp.lt.s32.totalorder %s875_s17, %s869_s18 }
  0x9e   : > { %p872_p4 = pneg %p871_p13  ;;  %p878_p2 = por %p877_p12, %p876_p10 }
  0xa0   : > { %p879_p9 = pnand %p878_p2, %p872_p4 }
 0x10f   : > { %v396_v39 = vpop.xlane.xlu0 %395 }
 0x110   : > { %v397_v40 = vrot.slane %v396_v39, 4 }
 0x112   : > { %v398_v41 = vmin.f32 %v396_v39, %v397_v40 }
 0x113   : > { %v406_v42 = vpop.xlane.xlu0 %405 }
 0x114   : > { %v399_v43 = vrot.slane %v398_v41, 2  ;;  %v407_v44 = vrot.slane %v406_v42, 4 }
 0x116   : > { %v408_v45 = vmax.f32 %v406_v42, %v407_v44  ;;  %v400_v46 = vmin.f32 %v398_v41, %v399_v43 }
 0x118   : > { %v409_v47 = vrot.slane %v408_v45, 2  ;;  %v401_v48 = vrot.slane %v400_v46, 1 }
 0x11a   : > { %v410_v49 = vmax.f32 %v408_v45, %v409_v47  ;;  %v402_v50 = vmin.f32 %v400_v46, %v401_v48 }
 0x11c   : > { %680 = vpush %v402_v50  ;;  %v411_v51 = vrot.slane %v410_v49, 1 }
 0x11e   : > { %v412_v52 = vmax.f32 %v410_v49, %v411_v51 }
 0x120   : > { %682 = vpush %v412_v52 }
 0x14d   : > { %s681_s14 = spop %680 }
 0x14e   : > { %v414_v53 = vstv %s681_s14 }
 0x14f   : > { %415 = vst [vmem:[%s329_s22] sm:$0xff] %v414_v53 }
 0x150   : > { %882 = shalt.err (!%p879_p9)
}
 0x151   : > { %s883_s13 = scalar_lea.hbm %s1253_s30, 128  ;;  %s887_s21 = scalar_lea.hbm %s1344_s5, 256 }
 0x152   : > { %p884_p5 = scmp.ne.s32.totalorder %s1253_s30, %s883_s13  ;;  %p888_p6 = scmp.lt.u32.totalorder %s1253_s30, %s1344_s5 }
 0x153   : > { %p889_p7 = scmp.lt.u32.totalorder %s887_s21, %s883_s13  ;;  %p891_p8 = scmp.lt.u32.totalorder %s883_s13, %s1253_s30 }
 0x154   : > { %p885_p0 = pnand %p884_p5, %p1368_p11 }
 0x155   : > { %p890_p3 = por %p889_p7, %p888_p6 }
 0x156   : > { %p886_p1 = pneg %p885_p0 }
 0x157   : > { %p892_p13 = por %p891_p8, %p890_p3 }
 0x159   : > { %p893_p4 = pnand %p892_p13, %p886_p1 }
 0x15b   : > { %896 = shalt.err (!%p893_p4)
}
 0x15c   : > { %695 = dma.vmem_to_hbm [thread:$0]  (%p1368_p11), %s1255_s8, 128, %s1253_s30, %s1259_s3  }
 0x15d   : > { %s683_s18 = spop %682  ;;  %s1288_s13 = scalar_lea.hbm %s1345_s6, %s674_s29 }
 0x15e   : > { %v416_v54 = vstv %s683_s18  ;;  %s897_s22 = scalar_lea.vmem %s1257_s1, 128  ;;  %s1002_s16 = smov [#allocation13]  }
 0x15f   : > { %417 = vst [vmem:[%s336_s15] sm:$0xff] %v416_v54  ;;  %p898_p10 = scmp.ne.s32.totalorder %s1257_s1, %s897_s22  ;;  %s901_s21 = sshll.u32 %s1002_s16, 4  ;;  %s902_s21 = int_to_ptr.vmem [resolvable:$false] %s901_s21 }
 0x160   : > { %s903_s14 = scalar_lea.vmem %s902_s21, 256  ;;  %p904_p9 = scmp.lt.s32.totalorder %s1257_s1, %s902_s21 }
 0x161   : > { %p899_p12 = pnand %p898_p10, %p1368_p11  ;;  %p905_p5 = scmp.lt.s32.totalorder %s903_s14, %s897_s22 }
 0x163   : > { %p900_p2 = pneg %p899_p12  ;;  %p906_p0 = por %p905_p5, %p904_p9 }
 0x165   : > { %p907_p1 = pnand %p906_p0, %p900_p2 }
 0x167   : > { %910 = shalt.err (!%p907_p1)
}
 0x168   : > { %s911_s26 = scalar_lea.hbm %s1288_s13, 128  ;;  %s915_s8 = scalar_lea.hbm %s1345_s6, 256 }
 0x169   : > { %p912_p6 = scmp.ne.s32.totalorder %s1288_s13, %s911_s26  ;;  %p916_p8 = scmp.lt.u32.totalorder %s1288_s13, %s1345_s6 }
 0x16a   : > { %p917_p13 = scmp.lt.u32.totalorder %s915_s8, %s911_s26  ;;  %p919_p10 = scmp.lt.u32.totalorder %s911_s26, %s1288_s13 }
 0x16b   : > { %p913_p7 = pnand %p912_p6, %p1368_p11 }
 0x16c   : > { %p918_p4 = por %p917_p13, %p916_p8 }
 0x16d   : > { %p914_p3 = pneg %p913_p7 }
 0x16e   : > { %p920_p12 = por %p919_p10, %p918_p4 }
 0x170   : > { %p921_p2 = pnand %p920_p12, %p914_p3 }
 0x172   : > { %924 = shalt.err (!%p921_p2)
}
 0x173   : > { %696 = dma.vmem_to_hbm [thread:$0]  (%p1368_p11), %s1257_s1, 128, %s1288_s13, %s1259_s3  }
 0x174 PF: > { %s486_s19 = sand.u32 1, %s971_s23   ;;  %p1369_p9 = scmp.ne.s32.totalorder %s1356_s10, 0 }
 0x175   : > { %p1370_p5 = scmp.ge.s32.totalorder %s991_s28, 2  ;;  %s487_s18 = scalar_lea.sflag [#allocation5], %s486_s19 }
 0x177   : > { %p712_p0 = pnand %p1370_p5, %p1369_p9 }
 0x179   : > { %962 = dma.done.wait (!%p712_p0), %s487_s18, 64  }
 0x17a   : > { %964 = vsyncadd (!%p712_p0), %s487_s18, 4294967232  ;;  %s1371_s12 = sadd.s32 4294967294, %s991_s28  }
 0x17b   : > { %s495_s17 = sand.u32 1, %s1371_s12  }
 0x17c   : > { %s496_s22 = scalar_lea.sflag [#allocation12], %s495_s17 }
 0x17d   : > { %966 = dma.done.wait (!%p712_p0), %s496_s22, 256  }
 0x17e   : > { %968 = vsyncadd (!%p712_p0), %s496_s22, 4294967040  ;;  %s29_s28 = sadd.s32 1, %s991_s28   ;;  %s1372_s23 = smov %s975_s24 }
 0x17f   : > { %p26_p11 = scmp.ge.s32.totalorder %s29_s28, 4   ;;  %s1373_s24 = smov %s979_s25 }
 0x180   : > { %s1374_s25 = smov %s1154_s7  ;;  %s1375_s26 = smov %s987_s27 }
 0x181   : > { %s1376_s27 = smov %s1378_s11  ;;  %28 = sbr.rel (!%p26_p11) target bundleno = 13 (0xd), region = 126 }
 0x188   :  { %510 = vsyncpa [#allocation4], 1 }
 0x189   :  { %512 = vsyncpa [#allocation4 + $0x1], 1 }
 0x18a   :  { %513 = vsyncpa [#allocation5], 1 }
 0x18b   :  { %515 = vsyncpa [#allocation5 + $0x1], 1 }
 0x18c   :  { %516 = vsyncpa [#allocation12], 1 }
 0x18d   :  { %518 = vsyncpa [#allocation12 + $0x1], 1 }
 0x18e   :  { %519 = vsyncpa [#allocation6], 1 }
 0x18f   :  { %521 = vsyncpa [#allocation6 + $0x1], 1 }
 0x190   :  { %522 = vsyncpa [#allocation9], 1 }

</bundles_post_ra>
